<compile_context>
chip_gen: v6e
topology: v6e:2x2x1
jax: 0.10.0
libtpu: 0.0.40
codegen_flags: <defaults>
</compile_context>

<pallas_src>
import functools

import jax
import jax.numpy as jnp
from jax import lax
from jax.experimental import pallas as pl
from jax.experimental.pallas import tpu as pltpu

_NEG_LARGE = float(jnp.finfo(jnp.float32).min)  # finite "-inf" (avoids inf-inf NaN)


def _ce_kernel(logits_ref, targets_ref, out_ref, m_sc, l_sc, t_sc,
               *, n_rows, n_cols, tm, tc):
    ni = pl.program_id(0)              # batch tile index  ("parallel")
    ci = pl.program_id(1)              # class tile index  ("arbitrary", reduction)
    n_ci = pl.num_programs(1)

    @pl.when(ci == 0)
    def _init():
        m_sc[...] = jnp.full_like(m_sc, _NEG_LARGE)   # running max
        l_sc[...] = jnp.zeros_like(l_sc)              # running sum(exp)
        t_sc[...] = jnp.zeros_like(t_sc)              # target logit

    logits = logits_ref[...].astype(jnp.float32)      # (tm, tc), f32 math in-kernel
    targets = targets_ref[...]                        # (tm, 1) int32

    # Small (1, tc) lane iota; no (tm, tc) int temporaries are materialized.
    col_lane = lax.broadcasted_iota(jnp.int32, (1, tc), 1)
    tgt_local = targets - ci * tc                     # (tm, 1) int32
    tgt_match = col_lane == tgt_local                 # broadcast compare (tm, tc)

    def update(vals):
        # vals: (tm, tc) f32, already restricted to valid class lanes.
        m_prev = m_sc[...]
        m_cur = jnp.max(vals, axis=-1, keepdims=True)
        m_new = jnp.maximum(m_prev, m_cur)
        alpha = jnp.exp(m_prev - m_new)
        p = jnp.exp(vals - m_new)
        l_sc[...] = alpha * l_sc[...] + jnp.sum(p, axis=-1, keepdims=True)
        m_sc[...] = m_new
        # Target logit: targets < n_cols, so padded lanes never match tgt_match.
        t_sc[...] = t_sc[...] + jnp.sum(
            jnp.where(tgt_match, vals, 0.0), axis=-1, keepdims=True)

    rem = n_cols % tc
    if rem == 0:
        # Every class tile is fully in-bounds: no masking anywhere.
        update(logits)
    else:
        # Unmasked fast path on interior tiles; masked path only on the last tile.
        @pl.when(ci < n_ci - 1)
        def _fast():
            update(logits)

        @pl.when(ci == n_ci - 1)
        def _masked():
            lane_ok = col_lane < rem                  # (1, tc), broadcasts
            update(jnp.where(lane_ok, logits, _NEG_LARGE))

    @pl.when(ci == n_ci - 1)
    def _finalize():
        lse = m_sc[...] + jnp.log(l_sc[...])          # (tm, 1)
        per_row = lse - t_sc[...]                     # -log_softmax[target]
        if n_rows % tm != 0:                          # trace-time gate
            row = lax.broadcasted_iota(jnp.int32, (tm, 1), 0) + ni * tm
            per_row = jnp.where(row < n_rows, per_row, 0.0)
        out_ref[...] = per_row


def cross_entropy_loss(pred_score, true_score, *, block_m=None, block_c=None):
    """pred_score: (N, C) float logits; true_score: (N,) integer class indices."""
    n, c = pred_score.shape
    tgt = true_score.astype(jnp.int32).reshape(n, 1)
    itemsize = jnp.dtype(pred_score.dtype).itemsize

    # Class tile: full C when it fits one block, else wide streaming blocks for
    # larger contiguous per-row DMA chunks (4096 for <=2-byte dtypes, 2048 for f32).
    if block_c is not None:
        tc = block_c
    else:
        tc_cap = 4096 if itemsize <= 2 else 2048
        tc = c if c <= tc_cap else tc_cap

    # Batch tile: ~4 MiB per logits buffer (double-buffered fits scoped VMEM on
    # v5e/v6e/v7x), multiple of 8.
    if block_m is not None:
        tm = block_m
    else:
        tm = max(8, min(1024, (4 * 1024 * 1024) // (tc * itemsize)))
        tm = max(8, (tm // 8) * 8)
        # v7x megacore: force >= 2 batch tiles so both TensorCores get work.
        if n > 8:
            half = max(8, (pl.cdiv(n, 2) // 8) * 8)
            tm = min(tm, half)
    if n <= tm:
        tm = n  # single row-block: block dim == full array dim is always valid

    grid = (pl.cdiv(n, tm), pl.cdiv(c, tc))
    kernel = functools.partial(_ce_kernel, n_rows=n, n_cols=c, tm=tm, tc=tc)

    # Explicit VMEM budget: double-buffered logits tile + small slack, clamped so it
    # is safe on v5e (16 MiB scoped default) up to v7x (64 MiB physical per TC).
    logits_buf = tm * tc * itemsize
    vmem_limit = int(min(32 * 1024 * 1024,
                         max(16 * 1024 * 1024, 2 * logits_buf + (2 << 20))))

    per_row = pl.pallas_call(
        kernel,
        out_shape=jax.ShapeDtypeStruct((n, 1), jnp.float32),
        grid_spec=pltpu.PrefetchScalarGridSpec(
            num_scalar_prefetch=0,
            grid=grid,
            in_specs=[
                pl.BlockSpec((tm, tc), lambda i, k: (i, k)),   # logits tile
                pl.BlockSpec((tm, 1), lambda i, k: (i, 0)),    # targets (per row tile)
            ],
            out_specs=pl.BlockSpec((tm, 1), lambda i, k: (i, 0)),
            scratch_shapes=[
                pltpu.VMEM((tm, 1), jnp.float32),  # running max m
                pltpu.VMEM((tm, 1), jnp.float32),  # running sum l
                pltpu.VMEM((tm, 1), jnp.float32),  # target logit
            ],
        ),
        compiler_params=pltpu.CompilerParams(
            dimension_semantics=("parallel", "arbitrary"),
            vmem_limit_bytes=vmem_limit,
        ),
    )(pred_score, tgt)

    # Single mean reduction in the wrapper (exact, one divide).
    return jnp.sum(per_row) / jnp.float32(n)


if __name__ == "__main__":
    key = jax.random.PRNGKey(0)
    k1, k2, k3, k4 = jax.random.split(key, 4)

    # Small shape consistent with the module: batch=8, num_classes=32.
    N, C = 8, 32
    pred_score = jax.random.normal(k1, (N, C), dtype=jnp.float32)
    true_score = jax.random.randint(k2, (N,), 0, C, dtype=jnp.int32)

    loss = cross_entropy_loss(pred_score, true_score)
    jax.block_until_ready(loss)

    ref = -jnp.mean(jax.nn.log_softmax(pred_score, axis=-1)[jnp.arange(N), true_score])
    assert jnp.allclose(loss, ref, atol=1e-5, rtol=1e-5), (loss, ref)

    # Exercise the tiled path: interior fast (unmasked) class tiles + masked last
    # class tile + padded last batch tile.
    N2, C2 = 40, 300
    pred2 = jax.random.normal(k3, (N2, C2), dtype=jnp.float32)
    true2 = jax.random.randint(k4, (N2,), 0, C2, dtype=jnp.int32)

    loss2 = cross_entropy_loss(pred2, true2, block_m=16, block_c=128)
    jax.block_until_ready(loss2)

    ref2 = -jnp.mean(jax.nn.log_softmax(pred2, axis=-1)[jnp.arange(N2), true2])
    assert jnp.allclose(loss2, ref2, atol=1e-5, rtol=1e-5), (loss2, ref2)

    print("KERNEL_OK")
</pallas_src>

<mosaic_0001>
module attributes {stable_mosaic.version = 11 : i64} {
  func.func @_ce_kernel(%arg0: i32, %arg1: i32, %arg2: memref<8x32xf32, #tpu.memory_space<vmem>>, %arg3: memref<8x1xi32, #tpu.memory_space<vmem>>, %arg4: memref<8x1xf32, #tpu.memory_space<vmem>>, %arg5: memref<8x1xf32, #tpu.memory_space<vmem>>, %arg6: memref<8x1xf32, #tpu.memory_space<vmem>>, %arg7: memref<8x1xf32, #tpu.memory_space<vmem>>) attributes {dimension_semantics = [#tpu.dimension_semantics<parallel>, #tpu.dimension_semantics<arbitrary>], iteration_bounds = array<i64: 1, 1>, scalar_prefetch = 0 : i64, scratch_operands = 3 : i64, tpu.core_type = #tpu.core_type<tc>, window_params = [{transform_indices = @transform_0, window_bounds = array<i64: 8, 32>}, {transform_indices = @transform_1, window_bounds = array<i64: 8, 1>}, {transform_indices = @transform_2, window_bounds = array<i64: 8, 1>}]} {
    %c0_i32 = arith.constant 0 : i32
    %0 = arith.cmpi eq, %arg1, %c0_i32 : i32
    %1 = arith.extui %0 : i1 to i32
    %c0_i32_0 = arith.constant 0 : i32
    %2 = arith.cmpi ne, %1, %c0_i32_0 : i32
    scf.if %2 {
      %cst_21 = arith.constant -3.40282347E+38 : f32
      %38 = vector.broadcast %cst_21 : f32 to vector<8x1xf32>
      %c0_22 = arith.constant 0 : index
      %c0_23 = arith.constant 0 : index
      %39 = vector.load %arg5[%c0_22, %c0_23] : memref<8x1xf32, #tpu.memory_space<vmem>>, vector<8x1xf32>
      tpu.vector_store %arg5[%c0_22, %c0_23], %38 {strides = array<i32>} : memref<8x1xf32, #tpu.memory_space<vmem>>, vector<8x1xf32>,
      %cst_24 = arith.constant 0.000000e+00 : f32
      %40 = vector.broadcast %cst_24 : f32 to vector<8x1xf32>
      %c0_25 = arith.constant 0 : index
      %c0_26 = arith.constant 0 : index
      %41 = vector.load %arg6[%c0_25, %c0_26] : memref<8x1xf32, #tpu.memory_space<vmem>>, vector<8x1xf32>
      tpu.vector_store %arg6[%c0_25, %c0_26], %40 {strides = array<i32>} : memref<8x1xf32, #tpu.memory_space<vmem>>, vector<8x1xf32>,
      %cst_27 = arith.constant 0.000000e+00 : f32
      %42 = vector.broadcast %cst_27 : f32 to vector<8x1xf32>
      %c0_28 = arith.constant 0 : index
      %c0_29 = arith.constant 0 : index
      %43 = vector.load %arg7[%c0_28, %c0_29] : memref<8x1xf32, #tpu.memory_space<vmem>>, vector<8x1xf32>
      tpu.vector_store %arg7[%c0_28, %c0_29], %42 {strides = array<i32>} : memref<8x1xf32, #tpu.memory_space<vmem>>, vector<8x1xf32>,
    } else {
    }
    %c0 = arith.constant 0 : index
    %c0_1 = arith.constant 0 : index
    %3 = vector.load %arg2[%c0, %c0_1] : memref<8x32xf32, #tpu.memory_space<vmem>>, vector<8x32xf32>
    %c0_2 = arith.constant 0 : index
    %c0_3 = arith.constant 0 : index
    %4 = vector.load %arg3[%c0_2, %c0_3] : memref<8x1xi32, #tpu.memory_space<vmem>>, vector<8x1xi32>
    %5 = tpu.iota {dimensions = array<i32: 1>} : vector<1x32xi32>
    %c32_i32 = arith.constant 32 : i32
    %6 = arith.muli %arg1, %c32_i32 : i32
    %7 = vector.broadcast %6 : i32 to vector<8x1xi32>
    %8 = arith.subi %4, %7 : vector<8x1xi32>
    %9 = vector.broadcast %5 : vector<1x32xi32> to vector<8x32xi32>
    %10 = vector.broadcast %8 : vector<8x1xi32> to vector<8x32xi32>
    %11 = arith.cmpi eq, %9, %10 : vector<8x32xi32>
    %c0_4 = arith.constant 0 : index
    %c0_5 = arith.constant 0 : index
    %12 = vector.load %arg5[%c0_4, %c0_5] : memref<8x1xf32, #tpu.memory_space<vmem>>, vector<8x1xf32>
    %cst = arith.constant dense<0xFF800000> : vector<8xf32>
    %13 = vector.multi_reduction <maximumf>, %3, %cst [1] : vector<8x32xf32> to vector<8xf32>
    %14 = vector.shape_cast %13 : vector<8xf32> to vector<8x1xf32>
    %15 = arith.maximumf %12, %14 : vector<8x1xf32>
    %16 = arith.subf %12, %15 : vector<8x1xf32>
    %17 = math.exp %16 : vector<8x1xf32>
    %18 = vector.broadcast %15 : vector<8x1xf32> to vector<8x32xf32>
    %19 = arith.subf %3, %18 : vector<8x32xf32>
    %20 = math.exp %19 : vector<8x32xf32>
    %c0_6 = arith.constant 0 : index
    %c0_7 = arith.constant 0 : index
    %21 = vector.load %arg6[%c0_6, %c0_7] : memref<8x1xf32, #tpu.memory_space<vmem>>, vector<8x1xf32>
    %22 = arith.mulf %17, %21 : vector<8x1xf32>
    %cst_8 = arith.constant dense<0.000000e+00> : vector<8xf32>
    %23 = vector.multi_reduction <add>, %20, %cst_8 [1] : vector<8x32xf32> to vector<8xf32>
    %24 = vector.shape_cast %23 : vector<8xf32> to vector<8x1xf32>
    %25 = arith.addf %22, %24 : vector<8x1xf32>
    %c0_9 = arith.constant 0 : index
    %c0_10 = arith.constant 0 : index
    %26 = vector.load %arg6[%c0_9, %c0_10] : memref<8x1xf32, #tpu.memory_space<vmem>>, vector<8x1xf32>
    tpu.vector_store %arg6[%c0_9, %c0_10], %25 {strides = array<i32>} : memref<8x1xf32, #tpu.memory_space<vmem>>, vector<8x1xf32>,
    %c0_11 = arith.constant 0 : index
    %c0_12 = arith.constant 0 : index
    %27 = vector.load %arg5[%c0_11, %c0_12] : memref<8x1xf32, #tpu.memory_space<vmem>>, vector<8x1xf32>
    tpu.vector_store %arg5[%c0_11, %c0_12], %15 {strides = array<i32>} : memref<8x1xf32, #tpu.memory_space<vmem>>, vector<8x1xf32>,
    %c0_13 = arith.constant 0 : index
    %c0_14 = arith.constant 0 : index
    %28 = vector.load %arg7[%c0_13, %c0_14] : memref<8x1xf32, #tpu.memory_space<vmem>>, vector<8x1xf32>
    %cst_15 = arith.constant 0.000000e+00 : f32
    %29 = vector.broadcast %cst_15 : f32 to vector<8x32xf32>
    %30 = arith.select %11, %3, %29 : vector<8x32xi1>, vector<8x32xf32>
    %cst_16 = arith.constant dense<0.000000e+00> : vector<8xf32>
    %31 = vector.multi_reduction <add>, %30, %cst_16 [1] : vector<8x32xf32> to vector<8xf32>
    %32 = vector.shape_cast %31 : vector<8xf32> to vector<8x1xf32>
    %33 = arith.addf %28, %32 : vector<8x1xf32>
    %c0_17 = arith.constant 0 : index
    %c0_18 = arith.constant 0 : index
    %34 = vector.load %arg7[%c0_17, %c0_18] : memref<8x1xf32, #tpu.memory_space<vmem>>, vector<8x1xf32>
    tpu.vector_store %arg7[%c0_17, %c0_18], %33 {strides = array<i32>} : memref<8x1xf32, #tpu.memory_space<vmem>>, vector<8x1xf32>,
    %c0_i32_19 = arith.constant 0 : i32
    %35 = arith.cmpi eq, %arg1, %c0_i32_19 : i32
    %36 = arith.extui %35 : i1 to i32
    %c0_i32_20 = arith.constant 0 : i32
    %37 = arith.cmpi ne, %36, %c0_i32_20 : i32
    scf.if %37 {
      %c0_21 = arith.constant 0 : index
      %c0_22 = arith.constant 0 : index
      %38 = vector.load %arg5[%c0_21, %c0_22] : memref<8x1xf32, #tpu.memory_space<vmem>>, vector<8x1xf32>
      %c0_23 = arith.constant 0 : index
      %c0_24 = arith.constant 0 : index
      %39 = vector.load %arg6[%c0_23, %c0_24] : memref<8x1xf32, #tpu.memory_space<vmem>>, vector<8x1xf32>
      %40 = math.log %39 : vector<8x1xf32>
      %41 = arith.addf %38, %40 : vector<8x1xf32>
      %c0_25 = arith.constant 0 : index
      %c0_26 = arith.constant 0 : index
      %42 = vector.load %arg7[%c0_25, %c0_26] : memref<8x1xf32, #tpu.memory_space<vmem>>, vector<8x1xf32>
      %43 = arith.subf %41, %42 : vector<8x1xf32>
      %c0_27 = arith.constant 0 : index
      %c0_28 = arith.constant 0 : index
      %44 = vector.load %arg4[%c0_27, %c0_28] : memref<8x1xf32, #tpu.memory_space<vmem>>, vector<8x1xf32>
      tpu.vector_store %arg4[%c0_27, %c0_28], %43 {strides = array<i32>} : memref<8x1xf32, #tpu.memory_space<vmem>>, vector<8x1xf32>,
    } else {
    }
    return
  }
  func.func @transform_0(%arg0: i32, %arg1: i32) -> (i32, i32) {
    %c0_i32 = arith.constant 0 : i32
    return %arg0, %arg1 : i32, i32
  }
  func.func @transform_1(%arg0: i32, %arg1: i32) -> (i32, i32) {
    %c0_i32 = arith.constant 0 : i32
    %c0_i32_0 = arith.constant 0 : i32
    return %arg0, %c0_i32 : i32, i32
  }
  func.func @transform_2(%arg0: i32, %arg1: i32) -> (i32, i32) {
    %c0_i32 = arith.constant 0 : i32
    %c0_i32_0 = arith.constant 0 : i32
    return %arg0, %c0_i32 : i32, i32
  }
}

</mosaic_0001>

<bundles_post_ra>
// kernel: tpu_custom_call.1
= control target key start
LH: loop header
LB: loop body
LE: loop exit
PB: predicated region body
PF: predicated region fallthrough
CT: control target
= control target key end

     0   :  { %vm31_vm0 = vcmask 261120   ;;  %vm15_vm1 = vcmask 7168   ;;  %v89_v1 = vmov -3.4028235e+38   ;;  %v90_v3 = vmov 0   ;;  %s126_s0 = inlined_call_operand.vmem [shape: f32[8,32], index: 0, kind: input, shape index: {}]   ;;  %s127_s1 = inlined_call_operand.vmem [shape: s32[8,1], index: 1, kind: input, shape index: {}]   ;;  %s128_s2 = inlined_call_operand.vmem [shape: f32[8,1], index: 2, kind: output, shape index: {}]  }
   0x1   :  { %v19_v0 = vld [vmem:[%s126_s0] sm:$0xff]  ;;  %16 = vst.msk [vmem:[#allocation2] sm:$0xff] %vm15_vm1, %v89_v1  ;;  %81 = vset.pattern.permute.xlu0 %v90_v3  ;;  %82 = vset.pattern.permute.xlu1 %v90_v3  ;;  %v91_v5 = vmov 0.0   ;;  %v21_v13 = vlaneseq }
   0x2   :  { %v32_v2 = vsel %vm31_vm0, %v19_v0, -inf  ;;  %v20_v4 = vld [vmem:[%s127_s1] sm:$0xff]  ;;  %17 = vst.msk [vmem:[#allocation3] sm:$0xff] %vm15_vm1, %v91_v5  ;;  %18 = vst.msk [vmem:[#allocation4] sm:$0xff] %vm15_vm1, %v91_v5 }
   0x3   :  { %33 = vmax.xlane.f32.xlu0 %v32_v2  ;;  %27 = vperm.xlu1 %82, %v20_v4   ;;  %v22_v14 = vand.u32 127, %v21_v13 }
   0x8   :  { %v30_v6 = vld [vmem:[#allocation2] sm:$0xff] }
   0x9   :  { %v47_v22 = vld [vmem:[#allocation3] sm:$0xff]  ;;  %v56_v26 = vld [vmem:[#allocation4] sm:$0xff] }
  0x7e   :  { %v28_v15 = vpop.permute.xlu1 %27 }
  0x7f   :  { %vm29_vm2 = vcmp.eq.s32.totalorder %v22_v14, %v28_v15 }
  0x80   :  { %v57_v17 = vsel %vm29_vm2, %v19_v0, 0.0 }
  0x81   :  { %v58_v19 = vsel %vm31_vm0, %v57_v17, 0.0 }
  0x8c   :  { %v34_v7 = vpop.xlane.xlu0 %33 }
  0x8d   :  { %v35_v8 = vmax.f32 %v30_v6, %v34_v7 }
  0x8f   :  { %v36_v9 = vsub.f32 %v30_v6, %v35_v8  ;;  %55 = vst.msk [vmem:[#allocation2] sm:$0xff] %vm15_vm1, %v35_v8  ;;  %41 = vperm.xlu0 %81, %v35_v8  }
  0x91   :  { %v37_v20 = vmul.f32 1.442695, %v36_v9 }
  0x96   :  { %v66_v32 = vld [vmem:[#allocation2] sm:$0xff] }
 0x10a   :  { %v42_v10 = vpop.permute.xlu0 %41 }
 0x10b   :  { %v44_v11 = vsub.f32 %v19_v0, %v42_v10 }
 0x10d   :  { %v45_v12 = vmul.f32 1.442695, %v44_v11 }
 0x10f   :  { %83 = vpow2.f32 %v45_v12 }
 0x110   :  { %85 = vpow2.f32 %v37_v20 }
 0x11c   :  { %v84_v16 = vpop.eup %83 }
 0x11d   :  { %v49_v18 = vsel %vm31_vm0, %v84_v16, 0.0  ;;  %v86_v21 = vpop.eup %85 }
 0x11e   :  { %50 = vadd.xlane.f32.xlu1 %v49_v18  ;;  %v48_v23 = vmul.f32 %v86_v21, %v47_v22 }
 0x122   :  { %59 = vadd.xlane.f32.xlu1 %v58_v19 }
 0x1a7   :  { %v51_v24 = vpop.xlane.xlu1 %50 }
 0x1a8   :  { %v52_v25 = vadd.f32 %v51_v24, %v48_v23 }
 0x1aa   :  { %54 = vst.msk [vmem:[#allocation3] sm:$0xff] %vm15_vm1, %v52_v25 }
 0x1ab   :  { %v60_v27 = vpop.xlane.xlu1 %59 }
 0x1ac   :  { %v61_v28 = vadd.f32 %v60_v27, %v56_v26 }
 0x1ae   :  { %62 = vst.msk [vmem:[#allocation4] sm:$0xff] %vm15_vm1, %v61_v28 }
 0x1b1   :  { %v67_v29 = vld [vmem:[#allocation3] sm:$0xff] }
 0x1b2   :  { %87 = vlog2.f32 %v67_v29 }
 0x1b5   :  { %v71_v33 = vld [vmem:[#allocation4] sm:$0xff] }
 0x1bf   :  { %v88_v30 = vpop.eup %87 }
 0x1c0   :  { %v69_v31 = vmul.f32 0.6931472, %v88_v30 }
 0x1c2   :  { %v70_v34 = vadd.f32 %v69_v31, %v66_v32 }
 0x1c4   :  { %v72_v35 = vsub.f32 %v70_v34, %v71_v33 }
 0x1c6   :  { %73 = vst.msk [vmem:[%s128_s2] sm:$0xff] %vm15_vm1, %v72_v35 }

</bundles_post_ra>
